<compile_context>
chip_gen: v6e
topology: v6e:2x2x1
jax: 0.10.0
libtpu: 0.0.40
codegen_flags: <defaults>
</compile_context>

<pallas_src>
import math
from functools import lru_cache

import numpy as np
import jax
import jax.numpy as jnp
from jax.experimental import pallas as pl
from jax.experimental.pallas import tpu as pltpu

# ---- model dimensions (small, consistent with the module's forward) ----
IMG = 16                       # input_shape = (16, 16, 1)
IMG_CH = 1
X_DIM = IMG * IMG * IMG_CH     # 256  (decoder output dim == H*W so view() works)
Z_DIM = 10                     # z_dim
ENC_HIDDEN = 32                # encoder hidden width
DEC_HIDDEN = 32                # decode_dim
NUM_HEADS = 5                  # nn.MultiheadAttention(embed_dim=z_dim, num_heads=5)
HEAD_DIM = Z_DIM // NUM_HEADS  # 2
BN_EPS = 1e-5
BATCH = 8

# ---- lane-banded packing layout (all offsets are multiples of 128) ----------
LANE = 128
# fused QKV matmul output / in_proj weight bands
QKV_Q_OFF, QKV_K_OFF, QKV_V_OFF = 0, LANE, 2 * LANE
QKV_WIDTH = 3 * LANE                               # 384
# z_mats bands: [ w_qkv (0:384) | w_o (384:394) | pad | dec_w1 (512:544) | pad ]
ZM_QKV_OFF, ZM_WO_OFF, ZM_DW1_OFF = 0, 3 * LANE, 4 * LANE
ZM_WIDTH = 5 * LANE                                # 640
# mu|logvar bands (enc_w_mulv columns, mulv output lanes)
MULV_MU_OFF, MULV_LV_OFF = 0, LANE
MULV_WIDTH = 2 * LANE                              # 256
# packed bias / folded-BN slab: (VEC_ROWS, VEC_WIDTH)
VEC_ROWS, VEC_WIDTH = 8, QKV_WIDTH                 # 8 x 384
_R_ENC_B1, _R_B_MULV, _R_B_QKV, _R_B_O = 0, 1, 2, 3
_R_BN_SCALE, _R_BN_SHIFT, _R_DEC_B1, _R_DEC_B2 = 4, 5, 6, 7
# masks slab: rowmask at lanes 0:Z_DIM, P = pool @ pool^T at lanes 128:128+H*N
MASK_P_OFF = LANE


# --------------------------- fused kernel -----------------------------------
def fused_vae_kernel(x_ref, eps_ref, enc_w1_ref, enc_wmulv_ref, zmats_ref,
                     dec_w2_ref, vecs_ref, masks_ref, recon_ref, mulv_ref):
    f32 = jnp.float32
    bf16 = jnp.bfloat16

    x = x_ref[...]                      # (N, X_DIM) f32
    eps = eps_ref[...]                  # (N, Z_DIM) f32
    vecs = vecs_ref[...]                # (VEC_ROWS, VEC_WIDTH) bias / folded-BN slab
    zmats = zmats_ref[...]              # (Z_DIM, ZM_WIDTH) lane-banded weight slab
    masks = masks_ref[...]              # (H*N, MASK_WIDTH) precomputed constants
    n = x.shape[0]
    c_total = NUM_HEADS * n

    # static, lane-aligned slices of the packed slabs (free views, no DMAs)
    enc_b1 = vecs[_R_ENC_B1:_R_ENC_B1 + 1, :ENC_HIDDEN]
    b_mulv = vecs[_R_B_MULV:_R_B_MULV + 1, :MULV_WIDTH]
    b_qkv = vecs[_R_B_QKV:_R_B_QKV + 1, :QKV_WIDTH]
    b_o = vecs[_R_B_O:_R_B_O + 1, :Z_DIM]
    bn_scale = vecs[_R_BN_SCALE:_R_BN_SCALE + 1, :Z_DIM]   # g * rsqrt(var+eps), folded host-side
    bn_shift = vecs[_R_BN_SHIFT:_R_BN_SHIFT + 1, :Z_DIM]   # b - mean * scale
    dec_b1 = vecs[_R_DEC_B1:_R_DEC_B1 + 1, :DEC_HIDDEN]
    dec_b2 = vecs[_R_DEC_B2:_R_DEC_B2 + 1, :X_DIM]

    w_qkv = zmats[:, ZM_QKV_OFF:ZM_QKV_OFF + QKV_WIDTH]     # (Z, 384) banded q|k|v
    w_o = zmats[:, ZM_WO_OFF:ZM_WO_OFF + Z_DIM]             # (Z, Z)
    dec_w1 = zmats[:, ZM_DW1_OFF:ZM_DW1_OFF + DEC_HIDDEN]   # (Z, DEC_HIDDEN)

    rowmask = masks[:, :Z_DIM]                              # (H*N, Z)
    pool2 = masks[:, MASK_P_OFF:MASK_P_OFF + c_total]       # (H*N, H*N) block-diag ones

    # ---------------- encoder MLP -> mu/logvar -> reparameterize --------------
    # bf16 operands feed the MXU; result and all elementwise work stay f32.
    h = jnp.dot(x.astype(bf16), enc_w1_ref[...], preferred_element_type=f32) + enc_b1
    h = jnp.maximum(h, 0.0)                                            # ReLU
    mulv = jnp.dot(h, enc_wmulv_ref[...], preferred_element_type=f32) + b_mulv
    mulv_ref[...] = mulv                                               # (N, 256) lane-dense out
    mu = mulv[:, MULV_MU_OFF:MULV_MU_OFF + Z_DIM]
    logvar = mulv[:, MULV_LV_OFF:MULV_LV_OFF + Z_DIM]
    z = mu + eps * jnp.exp(0.5 * logvar)                               # (N, Z)

    # ---------------- multi-head self-attention across the batch --------------
    # 1/sqrt(head_dim) is already folded into the q columns/bias of w_qkv/b_qkv.
    qkv = jnp.dot(z, w_qkv, preferred_element_type=f32) + b_qkv        # (N, 384)
    q = qkv[:, QKV_Q_OFF:QKV_Q_OFF + Z_DIM]
    k = qkv[:, QKV_K_OFF:QKV_K_OFF + Z_DIM]
    v = qkv[:, QKV_V_OFF:QKV_V_OFF + Z_DIM]

    k_stack = jnp.tile(k, (NUM_HEADS, 1)) * rowmask                    # (H*N, Z)
    v_stack = jnp.tile(v, (NUM_HEADS, 1)) * rowmask                    # (H*N, Z)

    # s[qrow, h*n + key] = <q[qrow, lanes of head h], k[key, lanes of head h]> * scale
    s = jax.lax.dot_general(q, k_stack, (((1,), (1,)), ((), ())),
                            preferred_element_type=f32)                # (N, H*N)
    s = s - jnp.max(s, axis=-1, keepdims=True)                         # global row max
    e = jnp.exp(s)
    # per-head softmax denominator: single block-pooling matmul (e @ P), clamped
    denom = jnp.maximum(jnp.dot(e, pool2, preferred_element_type=f32), 1e-30)
    probs = e * pl.reciprocal(denom, approx=True)                      # EUP recip

    # head outputs land directly in their own lanes (v_stack masked) -> no concat
    attn = jnp.dot(probs, v_stack, preferred_element_type=f32)         # (N, Z)
    attn = jnp.dot(attn, w_o, preferred_element_type=f32) + b_o        # out_proj

    # residual (+ dropout == identity in eval) and folded eval-mode BatchNorm
    z = (z + attn) * bn_scale + bn_shift

    # ---------------- decoder MLP -> Sigmoid ----------------------------------
    h1 = jnp.dot(z, dec_w1, preferred_element_type=f32) + dec_b1
    h1 = jnp.maximum(h1, 0.0)
    logits = jnp.dot(h1.astype(bf16), dec_w2_ref[...],
                     preferred_element_type=f32) + dec_b2
    recon_ref[...] = jax.nn.sigmoid(logits)                            # (N, X_DIM)


def fused_forward_call(x_flat, eps, masks, p):
    n = x_flat.shape[0]
    args = (x_flat, eps, p["enc_w1"], p["enc_w_mulv"], p["z_mats"],
            p["dec_w2"], p["vecs"], masks)
    vmem = lambda: pl.BlockSpec(memory_space=pltpu.MemorySpace.VMEM)
    recon_flat, mulv = pl.pallas_call(
        fused_vae_kernel,
        in_specs=[vmem() for _ in args],
        out_specs=(vmem(), vmem()),
        out_shape=(jax.ShapeDtypeStruct((n, X_DIM), jnp.float32),
                   jax.ShapeDtypeStruct((n, MULV_WIDTH), jnp.float32)),
    )(*args)
    return recon_flat, mulv


# --------------------- precomputed attention constants -----------------------
@lru_cache(maxsize=None)
def make_attention_masks(n):
    """rowmask (H*n, Z) and P = pool @ pool^T (H*n, H*n), packed lane-aligned."""
    c_total = NUM_HEADS * n
    rows = np.arange(c_total)[:, None]
    rowmask = (rows // n == (np.arange(Z_DIM)[None, :] // HEAD_DIM)).astype(np.float32)
    p_mat = (rows // n == (np.arange(c_total)[None, :] // n)).astype(np.float32)
    width = MASK_P_OFF + ((c_total + LANE - 1) // LANE) * LANE
    masks = np.zeros((c_total, width), np.float32)
    masks[:, :Z_DIM] = rowmask
    masks[:, MASK_P_OFF:MASK_P_OFF + c_total] = p_mat
    return jnp.asarray(masks)


# --------------------------- parameters -------------------------------------
def init_params(key):
    ks = jax.random.split(key, 16)

    def w(k, shape, scale):
        return (scale * jax.random.normal(k, shape)).astype(jnp.float32)

    # logical (unpacked) parameters — weights stored as (in, out)
    enc_w1 = w(ks[0], (X_DIM, ENC_HIDDEN), 0.05)
    enc_b1 = w(ks[1], (ENC_HIDDEN,), 0.01)
    enc_wmu = w(ks[2], (ENC_HIDDEN, Z_DIM), 0.1)
    enc_bmu = w(ks[3], (Z_DIM,), 0.01)
    enc_wlv = w(ks[4], (ENC_HIDDEN, Z_DIM), 0.1)
    enc_blv = w(ks[5], (Z_DIM,), 0.01)
    wq = w(ks[6], (Z_DIM, Z_DIM), 0.2)
    wk = w(ks[7], (Z_DIM, Z_DIM), 0.2)
    wv = w(ks[8], (Z_DIM, Z_DIM), 0.2)
    wo = w(ks[9], (Z_DIM, Z_DIM), 0.2)
    b_q = jnp.zeros((Z_DIM,), jnp.float32)   # PyTorch in_proj_bias init = 0
    b_k = jnp.zeros((Z_DIM,), jnp.float32)
    b_v = jnp.zeros((Z_DIM,), jnp.float32)
    bo = jnp.zeros((Z_DIM,), jnp.float32)
    bn_g = jnp.ones((Z_DIM,), jnp.float32)
    bn_b = jnp.zeros((Z_DIM,), jnp.float32)
    bn_m = jnp.zeros((Z_DIM,), jnp.float32)
    bn_v = jnp.ones((Z_DIM,), jnp.float32)
    dec_w1 = w(ks[10], (Z_DIM, DEC_HIDDEN), 0.2)
    dec_b1 = w(ks[11], (DEC_HIDDEN,), 0.01)
    dec_w2 = w(ks[12], (DEC_HIDDEN, X_DIM), 0.1)
    dec_b2 = w(ks[13], (X_DIM,), 0.01)

    # ---- host-side folding (free at inference) ------------------------------
    scale = 1.0 / math.sqrt(HEAD_DIM)
    wq_s, bq_s = wq * scale, b_q * scale                 # attention scale folded
    bn_scale = bn_g * jax.lax.rsqrt(bn_v + BN_EPS)       # eval-mode BN folded
    bn_shift = bn_b - bn_m * bn_scale

    # ---- lane-aligned host-side packing --------------------------------------
    enc_w_mulv = jnp.zeros((ENC_HIDDEN, MULV_WIDTH), jnp.float32)
    enc_w_mulv = enc_w_mulv.at[:, MULV_MU_OFF:MULV_MU_OFF + Z_DIM].set(enc_wmu)
    enc_w_mulv = enc_w_mulv.at[:, MULV_LV_OFF:MULV_LV_OFF + Z_DIM].set(enc_wlv)

    z_mats = jnp.zeros((Z_DIM, ZM_WIDTH), jnp.float32)
    z_mats = z_mats.at[:, QKV_Q_OFF:QKV_Q_OFF + Z_DIM].set(wq_s)
    z_mats = z_mats.at[:, QKV_K_OFF:QKV_K_OFF + Z_DIM].set(wk)
    z_mats = z_mats.at[:, QKV_V_OFF:QKV_V_OFF + Z_DIM].set(wv)
    z_mats = z_mats.at[:, ZM_WO_OFF:ZM_WO_OFF + Z_DIM].set(wo)
    z_mats = z_mats.at[:, ZM_DW1_OFF:ZM_DW1_OFF + DEC_HIDDEN].set(dec_w1)

    vecs = jnp.zeros((VEC_ROWS, VEC_WIDTH), jnp.float32)
    vecs = vecs.at[_R_ENC_B1, :ENC_HIDDEN].set(enc_b1)
    vecs = vecs.at[_R_B_MULV, MULV_MU_OFF:MULV_MU_OFF + Z_DIM].set(enc_bmu)
    vecs = vecs.at[_R_B_MULV, MULV_LV_OFF:MULV_LV_OFF + Z_DIM].set(enc_blv)
    vecs = vecs.at[_R_B_QKV, QKV_Q_OFF:QKV_Q_OFF + Z_DIM].set(bq_s)
    vecs = vecs.at[_R_B_QKV, QKV_K_OFF:QKV_K_OFF + Z_DIM].set(b_k)
    vecs = vecs.at[_R_B_QKV, QKV_V_OFF:QKV_V_OFF + Z_DIM].set(b_v)
    vecs = vecs.at[_R_B_O, :Z_DIM].set(bo)
    vecs = vecs.at[_R_BN_SCALE, :Z_DIM].set(bn_scale)
    vecs = vecs.at[_R_BN_SHIFT, :Z_DIM].set(bn_shift)
    vecs = vecs.at[_R_DEC_B1, :DEC_HIDDEN].set(dec_b1)
    vecs = vecs.at[_R_DEC_B2, :X_DIM].set(dec_b2)

    return {"enc_w1": enc_w1.astype(jnp.bfloat16),        # bf16 MXU operands
            "enc_w_mulv": enc_w_mulv,
            "z_mats": z_mats,
            "dec_w2": dec_w2.astype(jnp.bfloat16),
            "vecs": vecs}


# --------------------------- forward wrapper --------------------------------
@jax.jit
def resnet_vae_forward(x, params, eps, masks):
    """x: (N, 1, IMG, IMG) NCHW float32 -> (recon (N,1,IMG,IMG), mu, logvar)."""
    n = x.shape[0]
    x_flat = x.reshape(n, -1).astype(jnp.float32)
    recon_flat, mulv = fused_forward_call(x_flat, eps, masks, params)
    recon = recon_flat.reshape(n, 1, IMG, IMG)   # matches recon_x.view(-1,1,H,W)
    mu = mulv[:, MULV_MU_OFF:MULV_MU_OFF + Z_DIM]
    logvar = mulv[:, MULV_LV_OFF:MULV_LV_OFF + Z_DIM]
    return recon, mu, logvar


if __name__ == "__main__":
    key = jax.random.PRNGKey(0)
    k_x, k_eps, k_p = jax.random.split(key, 3)

    x = jax.random.uniform(k_x, (BATCH, IMG_CH, IMG, IMG), dtype=jnp.float32)
    eps = jax.random.normal(k_eps, (BATCH, Z_DIM), dtype=jnp.float32)
    params = init_params(k_p)
    masks = make_attention_masks(BATCH)

    recon, mu, logvar = resnet_vae_forward(x, params, eps, masks)
    jax.block_until_ready((recon, mu, logvar))

    assert recon.shape == (BATCH, 1, IMG, IMG)
    assert mu.shape == (BATCH, Z_DIM) and logvar.shape == (BATCH, Z_DIM)
    assert bool(jnp.all(jnp.isfinite(recon)))
    assert bool(jnp.all(recon >= 0.0)) and bool(jnp.all(recon <= 1.0))
    print("KERNEL_OK")
</pallas_src>

<mosaic_0001>
module attributes {stable_mosaic.version = 11 : i64} {
  func.func @fused_vae_kernel(%arg0: memref<8x256xf32, #tpu.memory_space<vmem>>, %arg1: memref<8x10xf32, #tpu.memory_space<vmem>>, %arg2: memref<256x32xbf16, #tpu.memory_space<vmem>>, %arg3: memref<32x256xf32, #tpu.memory_space<vmem>>, %arg4: memref<10x640xf32, #tpu.memory_space<vmem>>, %arg5: memref<32x256xbf16, #tpu.memory_space<vmem>>, %arg6: memref<8x384xf32, #tpu.memory_space<vmem>>, %arg7: memref<40x256xf32, #tpu.memory_space<vmem>>, %arg8: memref<8x256xf32, #tpu.memory_space<vmem>>, %arg9: memref<8x256xf32, #tpu.memory_space<vmem>>) attributes {dimension_semantics = [], scalar_prefetch = 0 : i64, scratch_operands = 0 : i64, tpu.core_type = #tpu.core_type<tc>} {
    %c0 = arith.constant 0 : index
    %c0_0 = arith.constant 0 : index
    %0 = vector.load %arg0[%c0, %c0_0] : memref<8x256xf32, #tpu.memory_space<vmem>>, vector<8x256xf32>
    %c0_1 = arith.constant 0 : index
    %c0_2 = arith.constant 0 : index
    %1 = vector.load %arg1[%c0_1, %c0_2] : memref<8x10xf32, #tpu.memory_space<vmem>>, vector<8x10xf32>
    %c0_3 = arith.constant 0 : index
    %c0_4 = arith.constant 0 : index
    %2 = vector.load %arg6[%c0_3, %c0_4] : memref<8x384xf32, #tpu.memory_space<vmem>>, vector<8x384xf32>
    %c0_5 = arith.constant 0 : index
    %c0_6 = arith.constant 0 : index
    %3 = vector.load %arg4[%c0_5, %c0_6] : memref<10x640xf32, #tpu.memory_space<vmem>>, vector<10x640xf32>
    %c0_7 = arith.constant 0 : index
    %c0_8 = arith.constant 0 : index
    %4 = vector.load %arg7[%c0_7, %c0_8] : memref<40x256xf32, #tpu.memory_space<vmem>>, vector<40x256xf32>
    %5 = vector.extract_strided_slice %2 {offsets = [0, 0], sizes = [1, 32], strides = [1, 1]} : vector<8x384xf32> to vector<1x32xf32>
    %6 = vector.extract_strided_slice %2 {offsets = [1, 0], sizes = [1, 256], strides = [1, 1]} : vector<8x384xf32> to vector<1x256xf32>
    %7 = vector.extract_strided_slice %2 {offsets = [2, 0], sizes = [1, 384], strides = [1, 1]} : vector<8x384xf32> to vector<1x384xf32>
    %8 = vector.extract_strided_slice %2 {offsets = [3, 0], sizes = [1, 10], strides = [1, 1]} : vector<8x384xf32> to vector<1x10xf32>
    %9 = vector.extract_strided_slice %2 {offsets = [4, 0], sizes = [1, 10], strides = [1, 1]} : vector<8x384xf32> to vector<1x10xf32>
    %10 = vector.extract_strided_slice %2 {offsets = [5, 0], sizes = [1, 10], strides = [1, 1]} : vector<8x384xf32> to vector<1x10xf32>
    %11 = vector.extract_strided_slice %2 {offsets = [6, 0], sizes = [1, 32], strides = [1, 1]} : vector<8x384xf32> to vector<1x32xf32>
    %12 = vector.extract_strided_slice %2 {offsets = [7, 0], sizes = [1, 256], strides = [1, 1]} : vector<8x384xf32> to vector<1x256xf32>
    %13 = vector.extract_strided_slice %3 {offsets = [0, 0], sizes = [10, 384], strides = [1, 1]} : vector<10x640xf32> to vector<10x384xf32>
    %14 = vector.extract_strided_slice %3 {offsets = [0, 384], sizes = [10, 10], strides = [1, 1]} : vector<10x640xf32> to vector<10x10xf32>
    %15 = vector.extract_strided_slice %3 {offsets = [0, 512], sizes = [10, 32], strides = [1, 1]} : vector<10x640xf32> to vector<10x32xf32>
    %16 = vector.extract_strided_slice %4 {offsets = [0, 0], sizes = [40, 10], strides = [1, 1]} : vector<40x256xf32> to vector<40x10xf32>
    %17 = vector.extract_strided_slice %4 {offsets = [0, 128], sizes = [40, 40], strides = [1, 1]} : vector<40x256xf32> to vector<40x40xf32>
    %18 = arith.truncf %0 : vector<8x256xf32> to vector<8x256xbf16>
    %c0_9 = arith.constant 0 : index
    %c0_10 = arith.constant 0 : index
    %19 = vector.load %arg2[%c0_9, %c0_10] : memref<256x32xbf16, #tpu.memory_space<vmem>>, vector<256x32xbf16>
    %cst = arith.constant dense<0.000000e+00> : vector<8x32xf32>
    %20 = tpu.matmul %18, %19, %cst {dimension_numbers = #tpu.dot_dimension_numbers<[1], [0], [0], [1], [0, 0, 1, 1], [], []>} : vector<8x256xbf16>, vector<256x32xbf16>, vector<8x32xf32> -> vector<8x32xf32>
    %21 = vector.broadcast %5 : vector<1x32xf32> to vector<8x32xf32>
    %22 = arith.addf %20, %21 : vector<8x32xf32>
    %cst_11 = arith.constant 0.000000e+00 : f32
    %23 = vector.broadcast %cst_11 : f32 to vector<8x32xf32>
    %24 = arith.maximumf %22, %23 : vector<8x32xf32>
    %c0_12 = arith.constant 0 : index
    %c0_13 = arith.constant 0 : index
    %25 = vector.load %arg3[%c0_12, %c0_13] : memref<32x256xf32, #tpu.memory_space<vmem>>, vector<32x256xf32>
    %cst_14 = arith.constant dense<0.000000e+00> : vector<8x256xf32>
    %26 = tpu.matmul %24, %25, %cst_14 {dimension_numbers = #tpu.dot_dimension_numbers<[1], [0], [0], [1], [0, 0, 1, 1], [], []>} : vector<8x32xf32>, vector<32x256xf32>, vector<8x256xf32> -> vector<8x256xf32>
    %27 = vector.broadcast %6 : vector<1x256xf32> to vector<8x256xf32>
    %28 = arith.addf %26, %27 : vector<8x256xf32>
    %c0_15 = arith.constant 0 : index
    %c0_16 = arith.constant 0 : index
    %29 = vector.load %arg9[%c0_15, %c0_16] : memref<8x256xf32, #tpu.memory_space<vmem>>, vector<8x256xf32>
    tpu.vector_store %arg9[%c0_15, %c0_16], %28 {strides = array<i32>} : memref<8x256xf32, #tpu.memory_space<vmem>>, vector<8x256xf32>,
    %30 = vector.extract_strided_slice %28 {offsets = [0, 0], sizes = [8, 10], strides = [1, 1]} : vector<8x256xf32> to vector<8x10xf32>
    %31 = vector.extract_strided_slice %28 {offsets = [0, 128], sizes = [8, 10], strides = [1, 1]} : vector<8x256xf32> to vector<8x10xf32>
    %cst_17 = arith.constant 5.000000e-01 : f32
    %32 = vector.broadcast %cst_17 : f32 to vector<8x10xf32>
    %33 = arith.mulf %32, %31 : vector<8x10xf32>
    %34 = math.exp %33 : vector<8x10xf32>
    %35 = arith.mulf %1, %34 : vector<8x10xf32>
    %36 = arith.addf %30, %35 : vector<8x10xf32>
    %cst_18 = arith.constant dense<0.000000e+00> : vector<8x384xf32>
    %37 = tpu.matmul %36, %13, %cst_18 {dimension_numbers = #tpu.dot_dimension_numbers<[1], [0], [0], [1], [0, 0, 1, 1], [], []>} : vector<8x10xf32>, vector<10x384xf32>, vector<8x384xf32> -> vector<8x384xf32>
    %38 = vector.broadcast %7 : vector<1x384xf32> to vector<8x384xf32>
    %39 = arith.addf %37, %38 : vector<8x384xf32>
    %40 = vector.extract_strided_slice %39 {offsets = [0, 0], sizes = [8, 10], strides = [1, 1]} : vector<8x384xf32> to vector<8x10xf32>
    %41 = vector.extract_strided_slice %39 {offsets = [0, 128], sizes = [8, 10], strides = [1, 1]} : vector<8x384xf32> to vector<8x10xf32>
    %42 = vector.extract_strided_slice %39 {offsets = [0, 256], sizes = [8, 10], strides = [1, 1]} : vector<8x384xf32> to vector<8x10xf32>
    %43 = tpu.concatenate %41, %41, %41, %41, %41 in 0 : vector<8x10xf32>, vector<8x10xf32>, vector<8x10xf32>, vector<8x10xf32>, vector<8x10xf32> -> vector<40x10xf32>
    %44 = arith.mulf %43, %16 : vector<40x10xf32>
    %45 = tpu.concatenate %42, %42, %42, %42, %42 in 0 : vector<8x10xf32>, vector<8x10xf32>, vector<8x10xf32>, vector<8x10xf32>, vector<8x10xf32> -> vector<40x10xf32>
    %46 = arith.mulf %45, %16 : vector<40x10xf32>
    %cst_19 = arith.constant dense<0.000000e+00> : vector<8x40xf32>
    %47 = tpu.matmul %40, %44, %cst_19 {dimension_numbers = #tpu.dot_dimension_numbers<[1], [1], [0], [0], [0, 0, 1, 0], [], []>} : vector<8x10xf32>, vector<40x10xf32>, vector<8x40xf32> -> vector<8x40xf32>
    %cst_20 = arith.constant dense<0xFF800000> : vector<8xf32>
    %48 = vector.multi_reduction <maximumf>, %47, %cst_20 [1] : vector<8x40xf32> to vector<8xf32>
    %49 = vector.shape_cast %48 : vector<8xf32> to vector<8x1xf32>
    %50 = vector.broadcast %49 : vector<8x1xf32> to vector<8x40xf32>
    %51 = arith.subf %47, %50 : vector<8x40xf32>
    %52 = math.exp %51 : vector<8x40xf32>
    %cst_21 = arith.constant dense<0.000000e+00> : vector<8x40xf32>
    %53 = tpu.matmul %52, %17, %cst_21 {dimension_numbers = #tpu.dot_dimension_numbers<[1], [0], [0], [1], [0, 0, 1, 1], [], []>} : vector<8x40xf32>, vector<40x40xf32>, vector<8x40xf32> -> vector<8x40xf32>
    %cst_22 = arith.constant 1.000000e-30 : f32
    %54 = vector.broadcast %cst_22 : f32 to vector<8x40xf32>
    %55 = arith.maximumf %53, %54 : vector<8x40xf32>
    %56 = tpu.reciprocal %55 {approx = true} : vector<8x40xf32> -> vector<8x40xf32>
    %57 = arith.mulf %52, %56 : vector<8x40xf32>
    %cst_23 = arith.constant dense<0.000000e+00> : vector<8x10xf32>
    %58 = tpu.matmul %57, %46, %cst_23 {dimension_numbers = #tpu.dot_dimension_numbers<[1], [0], [0], [1], [0, 0, 1, 1], [], []>} : vector<8x40xf32>, vector<40x10xf32>, vector<8x10xf32> -> vector<8x10xf32>
    %cst_24 = arith.constant dense<0.000000e+00> : vector<8x10xf32>
    %59 = tpu.matmul %58, %14, %cst_24 {dimension_numbers = #tpu.dot_dimension_numbers<[1], [0], [0], [1], [0, 0, 1, 1], [], []>} : vector<8x10xf32>, vector<10x10xf32>, vector<8x10xf32> -> vector<8x10xf32>
    %60 = vector.broadcast %8 : vector<1x10xf32> to vector<8x10xf32>
    %61 = arith.addf %59, %60 : vector<8x10xf32>
    %62 = arith.addf %36, %61 : vector<8x10xf32>
    %63 = vector.broadcast %9 : vector<1x10xf32> to vector<8x10xf32>
    %64 = arith.mulf %62, %63 : vector<8x10xf32>
    %65 = vector.broadcast %10 : vector<1x10xf32> to vector<8x10xf32>
    %66 = arith.addf %64, %65 : vector<8x10xf32>
    %cst_25 = arith.constant dense<0.000000e+00> : vector<8x32xf32>
    %67 = tpu.matmul %66, %15, %cst_25 {dimension_numbers = #tpu.dot_dimension_numbers<[1], [0], [0], [1], [0, 0, 1, 1], [], []>} : vector<8x10xf32>, vector<10x32xf32>, vector<8x32xf32> -> vector<8x32xf32>
    %68 = vector.broadcast %11 : vector<1x32xf32> to vector<8x32xf32>
    %69 = arith.addf %67, %68 : vector<8x32xf32>
    %cst_26 = arith.constant 0.000000e+00 : f32
    %70 = vector.broadcast %cst_26 : f32 to vector<8x32xf32>
    %71 = arith.maximumf %69, %70 : vector<8x32xf32>
    %72 = arith.truncf %71 : vector<8x32xf32> to vector<8x32xbf16>
    %c0_27 = arith.constant 0 : index
    %c0_28 = arith.constant 0 : index
    %73 = vector.load %arg5[%c0_27, %c0_28] : memref<32x256xbf16, #tpu.memory_space<vmem>>, vector<32x256xbf16>
    %cst_29 = arith.constant dense<0.000000e+00> : vector<8x256xf32>
    %74 = tpu.matmul %72, %73, %cst_29 {dimension_numbers = #tpu.dot_dimension_numbers<[1], [0], [0], [1], [0, 0, 1, 1], [], []>} : vector<8x32xbf16>, vector<32x256xbf16>, vector<8x256xf32> -> vector<8x256xf32>
    %75 = vector.broadcast %12 : vector<1x256xf32> to vector<8x256xf32>
    %76 = arith.addf %74, %75 : vector<8x256xf32>
    %77 = arith.negf %76 : vector<8x256xf32>
    %78 = math.exp %77 : vector<8x256xf32>
    %cst_30 = arith.constant 1.000000e+00 : f32
    %79 = vector.broadcast %cst_30 : f32 to vector<8x256xf32>
    %80 = arith.addf %79, %78 : vector<8x256xf32>
    %81 = arith.divf %79, %80 : vector<8x256xf32>
    %c0_31 = arith.constant 0 : index
    %c0_32 = arith.constant 0 : index
    %82 = vector.load %arg8[%c0_31, %c0_32] : memref<8x256xf32, #tpu.memory_space<vmem>>, vector<8x256xf32>
    tpu.vector_store %arg8[%c0_31, %c0_32], %81 {strides = array<i32>} : memref<8x256xf32, #tpu.memory_space<vmem>>, vector<8x256xf32>,
    return
  }
}

</mosaic_0001>

<bundles_post_ra>
// kernel: resnet_vae_forward.1
= control target key start
LH: loop header
LB: loop body
LE: loop exit
PB: predicated region body
PF: predicated region fallthrough
CT: control target
= control target key end

     0   :  { %15 = vsyncpa [#allocation3], 0  ;;  %s1248_s30 = smov [#allocation2]   ;;  %s1555_s0 = inlined_call_operand.vmem [shape: f32[8,256], index: 0, kind: input, shape index: {}]   ;;  %s1556_s1 = inlined_call_operand.vmem [shape: f32[8,10], index: 1, kind: input, shape index: {}]   ;;  %s1557_s2 = inlined_call_operand.vmem [shape: bf16[256,32], index: 2, kind: input, shape index: {}]   ;;  %s1558_s3 = inlined_call_operand.vmem [shape: f32[32,256], index: 3, kind: input, shape index: {}]   ;;  %s1559_s4 = inlined_call_operand.vmem [shape: f32[10,640], index: 4, kind: input, shape index: {}]   ;;  %s1560_s5 = inlined_call_operand.vmem [shape: bf16[32,256], index: 5, kind: input, shape index: {}]   ;;  %s1561_s6 = inlined_call_operand.hbm [shape: f32[8,384], index: 6, kind: input, shape index: {}]   ;;  %s1562_s7 = inlined_call_operand.vmem [shape: f32[40,256], index: 7, kind: input, shape index: {}]   ;;  %s1563_s8 = inlined_call_operand.vmem [shape: f32[8,256], index: 8, kind: output, shape index: {0}]   ;;  %s1564_s9 = inlined_call_operand.vmem [shape: f32[8,256], index: 9, kind: output, shape index: {1}]  }
   0x1   :  { %s34_s10 = sshll.u32 %s1248_s30, 4  ;;  %s35_s10 = int_to_ptr.vmem [resolvable:$true] %s34_s10 }
   0x2   :  { %s1234_s11 = scalar_lea.vmem %s35_s10, 384  ;;  %p1239_p1 = scmp.lt.s32.totalorder %s35_s10, %s35_s10 }
   0x3   :  { %p1235_p0 = scmp.ne.s32.totalorder %s35_s10, %s1234_s11  ;;  %p1240_p2 = scmp.lt.s32.totalorder %s1234_s11, %s1234_s11 }
   0x5   :  { %p1241_p3 = por %p1240_p2, %p1239_p1 }
   0x7   :  { %p1242_p4 = pnand %p1241_p3, %p1235_p0 }
   0x9   :  { %1245 = shalt.err (!%p1242_p4)
}
   0xa   :  { %37 = dma.hbm_to_vmem [thread:$0]  %s1561_s6, 384, %s35_s10, [#allocation3]  }
   0xb   :  { %1246 = dma.done.wait [#allocation3], 384  }
   0xc   :  { %1247 = vsyncadd [#allocation3], 4294966912  ;;  %v1190_v0 = vld [vmem:[%s1557_s2 + $0x78] sm:$0xff]   ;;  %v1192_v2 = vld [vmem:[%s1557_s2 + $0x70] sm:$0xff]   ;;  %v1249_v28 = vmov 0.0   ;;  %v104_v29 = vlaneseq  ;;  %vm261_vm0 = vcmask 261120  }
   0xd   :  { %v1191_v1 = vld [vmem:[%s1557_s2 + $0x38] sm:$0xff]   ;;  %1077 = vmatprep.subr.bf16.mxu0 %v1190_v0  ;;  %v1193_v3 = vld [vmem:[%s1557_s2 + $0x30] sm:$0xff]   ;;  %v1194_v4 = vld [vmem:[%s1557_s2 + $0x68] sm:$0xff]   ;;  %329 = vmatprep.mubr.f32.mxu1 %v1249_v28  ;;  %vm359_vm1 = vcmask 1041408   ;;  %vm1250_vm2 = vmmov 0   ;;  %vm355_vm3 = vcmask 80896  }
   0xe   :  { %1078 = vmatpush3.bf16.msra.mxu0 %v1191_v1  ;;  %v1195_v5 = vld [vmem:[%s1557_s2 + $0x28] sm:$0xff]   ;;  %v1196_v6 = vld [vmem:[%s1557_s2 + $0x60] sm:$0xff]   ;;  %v1198_v8 = vld [vmem:[%s1557_s2 + $0x58] sm:$0xff]   ;;  %v1385_v30 = vshrl.u32 %v104_v29, 7  ;;  %vm608_vm4 = vcmask 326656  }
   0xf   :  { %1079 = vmatprep.subr.bf16.mxu0 %v1192_v2  ;;  %v1197_v7 = vld [vmem:[%s1557_s2 + $0x20] sm:$0xff]   ;;  %v1199_v9 = vld [vmem:[%s1557_s2 + $0x18] sm:$0xff]   ;;  %v1200_v10 = vld [vmem:[%s1557_s2 + $0x50] sm:$0xff]  }
  0x10   :  { %v45_v11 = vld [vmem:[%s1555_s0 + $0x8] sm:$0xff]  ;;  %v1201_v13 = vld [vmem:[%s1557_s2 + $0x10] sm:$0xff]   ;;  %v1204_v16 = vld [vmem:[%s1557_s2 + $0x40] sm:$0xff]   ;;  %v106_v31 = vsub.s32 0, %v1385_v30  ;;  %v255_v45 = vsub.s32 1, %v1385_v30  ;;  %v345_v61 = vsub.s32 2, %v1385_v30 }
  0x11   :  { %v71_v12 = vpack.c.bf16 %v45_v11, %v45_v11  ;;  %v1202_v14 = vld [vmem:[%s1557_s2 + $0x48] sm:$0xff]   ;;  %v1205_v17 = vld [vmem:[%s1557_s2] sm:$0xff]   ;;  %v252_v20 = vld [vmem:[%s1558_s3 + $0x38] sm:$0xff] }
  0x12   :  { %1080 = vmatpush3.bf16.msra.mxu0 %v1193_v3  ;;  %v1203_v15 = vld [vmem:[%s1557_s2 + $0x8] sm:$0xff]   ;;  %v44_v18 = vld [vmem:[%s1555_s0] sm:$0xff]  ;;  %289 = vmatprep.subr.mxu1 %v252_v20  ;;  %v251_v21 = vld [vmem:[%s1558_s3 + $0x30] sm:$0xff] }
  0x13   :  { %1081 = vmatprep.subr.bf16.mxu0 %v1194_v4  ;;  %236 = vmatprep.mubr.bf16.mxu0 %v71_v12  ;;  %v70_v19 = vpack.c.bf16 %v44_v18, %v44_v18  ;;  %v250_v22 = vld [vmem:[%s1558_s3 + $0x28] sm:$0xff]  ;;  %v249_v23 = vld [vmem:[%s1558_s3 + $0x20] sm:$0xff]  ;;  %v248_v24 = vld [vmem:[%s1558_s3 + $0x18] sm:$0xff] }
  0x14   :  { %290 = vmatpush1.msra.mxu1 %v251_v21  ;;  %v247_v25 = vld [vmem:[%s1558_s3 + $0x10] sm:$0xff]  ;;  %v246_v26 = vld [vmem:[%s1558_s3 + $0x8] sm:$0xff]  ;;  %v245_v27 = vld [vmem:[%s1558_s3] sm:$0xff] }
  0x15   :  { %291 = vmatprep.subr.mxu1 %v250_v22  ;;  %v1388_v32 = vld [vmem:[#allocation2] sm:$0xff]  ;;  %v56_v41 = vld [vmem:[%s1559_s4 + $0x30] sm:$0x3]  ;;  %v55_v42 = vld [vmem:[%s1559_s4 + $0x28] sm:$0x3] }
  0x16   :  { %1082 = vmatpush3.bf16.msra.mxu0 %v1195_v5  ;;  %292 = vmatpush1.msra.mxu1 %v249_v23  ;;  %v107_v34 = vrot.slane %v1388_v32, %v106_v31  ;;  %v51_v43 = vld [vmem:[%s1559_s4 + $0x8] sm:$0xff]  ;;  %v50_v44 = vld [vmem:[%s1559_s4] sm:$0xff]  ;;  %v256_v47 = vrot.slane %v1388_v32, %v255_v45  ;;  %v57_v59 = vld [vmem:[%s1559_s4 + $0x38] sm:$0x3] }
  0x17   :  { %1083 = vmatprep.subr.bf16.mxu0 %v1196_v6  ;;  %293 = vmatprep.subr.mxu1 %v248_v24  ;;  %v1411_v46 = vld [vmem:[#allocation2 + $0x8] sm:$0xff]  ;;  %v46_v55 = vld [vmem:[%s1556_s1] sm:$0xff]  ;;  %v52_v60 = vld [vmem:[%s1559_s4 + $0x10] sm:$0xff] }
  0x18   :  { %294 = vmatpush1.msra.mxu1 %v247_v25  ;;  %v260_v48 = vrot.slane %v1411_v46, %v255_v45  ;;  %v350_v62 = vrot.slane %v1411_v46, %v345_v61  ;;  %v68_v1 = vld [vmem:[%s1562_s7 + $0x40] sm:$0xff]  ;;  %v66_v6 = vld [vmem:[%s1562_s7 + $0x30] sm:$0xff]  ;;  %v67_v29 = vld [vmem:[%s1562_s7 + $0x38] sm:$0xff] }
  0x19   :  { %295 = vmatprep.subr.mxu1 %v246_v26  ;;  %v62_v11 = vld [vmem:[%s1562_s7 + $0x10] sm:$0xff]  ;;  %v65_v31 = vld [vmem:[%s1562_s7 + $0x28] sm:$0xff] }
  0x1a   :  { %1084 = vmatpush3.bf16.msra.mxu0 %v1197_v7  ;;  %296 = vmatpush1.msra.mxu1 %v245_v27  ;;  %v69_v27 = vld [vmem:[%s1562_s7 + $0x48] sm:$0xff] }
  0x1b   :  { %1085 = vmatprep.subr.bf16.mxu0 %v1198_v8  ;;  %1053 = vmatprep.subr.msk.mxu1 %vm359_vm1, %v56_v41  ;;  %v64_v8 = vld [vmem:[%s1562_s7 + $0x20] sm:$0xff] }
  0x1e   :  { %1086 = vmatpush3.bf16.msra.mxu0 %v1199_v9 }
  0x1f   :  { %1087 = vmatprep.subr.bf16.mxu0 %v1200_v10  ;;  %v49_v10 = vld [vmem:[#allocation2 + $0x10] sm:$0xff] }
  0x20   :  { %v354_v12 = vrot.slane %v49_v10, %v345_v61  ;;  %v943_v10 = vsub.s32 7, %v1385_v30 }
  0x22   :  { %1088 = vmatpush3.bf16.msra.mxu0 %v1201_v13 }
  0x23   :  { %1089 = vmatprep.subr.bf16.mxu0 %v1202_v14  ;;  %v60_v14 = vld [vmem:[%s1562_s7] sm:$0xff] }
  0x26   :  { %1090 = vmatpush3.bf16.msra.mxu0 %v1203_v15  ;;  %v346_v15 = vrot.slane %v1388_v32, %v345_v61 }
  0x27   :  { %1091 = vmatprep.subr.bf16.mxu0 %v1204_v16 }
  0x2a   :  { %1092 = vmatpush3.bf16.msra.mxu0 %v1205_v17 }
  0x2b   :  { %1146 = vmatprep.subr.mxu0 %v1249_v28 }
  0x2d   :  { %237 = vmatmul.mubr.bf16.vlgmr.msra.gmra.mxu0 %v70_v19 }
  0x2e   :  { %1156 = vmatprep.mubr.msk.f32.mxu0 %vm1250_vm2, %v1249_v28  ;;  %1147 = vmatpush3.msra.mxu0 %v69_v27 }
  0x2f   :  { %1148 = vmatprep.subr.mxu0 %v1249_v28 }
  0x30   :  { %1149 = vmatpush3.msra.mxu0 %v67_v29 }
  0x31   :  { %1150 = vmatprep.subr.mxu0 %v1249_v28 }
  0x32   :  { %1151 = vmatpush3.msra.mxu0 %v65_v31 }
  0x33   :  { %1152 = vmatprep.subr.mxu0 %v1249_v28 }
  0xed   :  { %v1093_v33 = vpop.f32.mrf.mxu0 }
  0xef   :  { %v1094_v35 = vpop.f32.mrf.mxu0 }
  0xf0   :  { %v1095_v36 = vadd.f32 %v1094_v35, %v1093_v33  ;;  %v63_v33 = vld [vmem:[%s1562_s7 + $0x18] sm:$0xff] }
  0xf1   :  { %v1096_v37 = vpop.f32.mrf.mxu0  ;;  %1153 = vmatpush3.msra.mxu0 %v63_v33 }
  0xf2   :  { %v239_v38 = vadd.f32 %v1095_v36, %v107_v34  ;;  %v61_v34 = vld [vmem:[%s1562_s7 + $0x8] sm:$0xff]  ;;  %1154 = vmatprep.subr.mxu0 %v1249_v28 }
  0xf3   :  { %v1097_v39 = vpop.f32.mrf.mxu0  ;;  %1155 = vmatpush3.msra.mxu0 %v61_v34 }
  0xf4   :  { %v244_v40 = vmax.f32 %v239_v38, 0.0  ;;  %1172 = vmatprep.subr.mxu0 %v1249_v28  ;;  %v58_v39 = vld [vmem:[%s1559_s4 + $0x40] sm:$0x3] }
  0xf6   :  { %1052 = vmatmul.mubr.msk.f32.vlgmr.msra.gmra.mxu1 %vm261_vm0, %v244_v40  ;;  %v53_v40 = vld [vmem:[%s1559_s4 + $0x18] sm:$0xff] }
  0xf7   :  { %433 = vmatprep.mubr.f32.mxu1 %v1249_v28  ;;  %1054 = vmatpush1.msk.msra.mxu1 %vm359_vm1, %v55_v42 }
  0xf8   :  { %399 = vmatprep.subr.mxu1 %v51_v43 }
  0xf9   :  { %400 = vmatpush1.msra.mxu1 %v50_v44 }
  0xfa   :  { %1126 = vmatprep.subr.mxu1 %v1249_v28 }
 0x1b6   :  { %v331_v49 = vpop.f32.mrf.mxu1 }
 0x1b7   :  { %v332_v50 = vadd.f32 %v331_v49, %v256_v47  ;;  %v59_v49 = vld [vmem:[%s1559_s4 + $0x48] sm:$0x3] }
 0x1b8   :  { %v333_v51 = vpop.f32.mrf.mxu1 }
 0x1b9   :  { %336 = vst [vmem:[%s1564_s9] sm:$0xff] %v332_v50  ;;  %v334_v52 = vadd.f32 %v333_v51, %v260_v48  ;;  %v1206_v51 = vld [vmem:[%s1560_s5 + $0x10] ss:$8 sps:$4 sm:$0xff]  }
 0x1bb   :  { %337 = vst [vmem:[%s1564_s9 + $0x8] sm:$0xff] %v334_v52  ;;  %v338_v53 = vmul.f32 0.5, %v334_v52  ;;  %v1208_v52 = vld [vmem:[%s1560_s5 + $0x14] ss:$8 sps:$4 sm:$0xff]  }
 0x1bd   :  { %v339_v54 = vmul.f32 1.442695, %v338_v53  ;;  %v766_v53 = vsub.s32 3, %v1385_v30 }
 0x1bf   :  { %1212 = vpow2.f32 %v339_v54  ;;  %v767_v54 = vrot.slane %v1388_v32, %v766_v53 }
 0x1cc   :  { %v1213_v56 = vpop.eup %1212 }
 0x1cd   :  { %v341_v57 = vmul.f32 %v1213_v56, %v46_v55  ;;  %v847_v55 = vsub.s32 4, %v1385_v30  ;;  %v852_v56 = vsub.s32 5, %v1385_v30 }
 0x1cf   :  { %v1424_v58 = vadd.f32 %v341_v57, %v332_v50  ;;  %v54_v50 = vld [vmem:[%s1559_s4 + $0x20] sm:$0xff] }
 0x1d1   :  { %1055 = vmatmul.mubr.msk.f32.vlgmr.msra.gmra.mxu1 %vm355_vm3, %v1424_v58 }
 0x1d2   :  { %1127 = vmatpush3.msk.msra.mxu1 %vm359_vm1, %v57_v59  ;;  %1130 = vmatprep.mubr.msk.f32.mxu1 %vm1250_vm2, %v1249_v28  ;;  %v848_v59 = vrot.slane %v1388_v32, %v847_v55 }
 0x1d3   :  { %1128 = vmatprep.subr.mxu1 %v1249_v28 }
 0x1d4   :  { %1129 = vmatpush3.msra.mxu1 %v52_v60 }
 0x1d5   :  { %1131 = vmatmul.mubr.msk.f32.vlgmr.msra.gmra.mxu1 %vm355_vm3, %v1424_v58  ;;  %1133 = vmatprep.subr.mxu1 %v1249_v28 }
 0x1d6   :  { %1143 = vmatprep.mubr.msk.f32.mxu1 %vm1250_vm2, %v1249_v28 }
 0x291   :  { %v435_v63 = vpop.f32.mrf.mxu1 }
 0x292   :  { %v436_v18 = vadd.f32 %v435_v63, %v346_v15 }
 0x293   :  { %v437_v0 = vpop.f32.mrf.mxu1 }
 0x294   :  { %v438_v2 = vadd.f32 %v437_v0, %v350_v62  ;;  %v853_v62 = vrot.slane %v1388_v32, %v852_v56 }
 0x295   :  { %v506_v3 = vpop.f32.mrf.mxu1 }
 0x296   :  { %v514_v4 = vmul.f32 %v438_v2, %v68_v1  ;;  %v513_v7 = vmul.f32 %v438_v2, %v66_v6  ;;  %v512_v9 = vmul.f32 %v438_v2, %v64_v8  ;;  %v511_v13 = vmul.f32 %v438_v2, %v62_v11 }
 0x297   :  { %v1132_v5 = vpop.f32.mrf.mxu1  ;;  %v507_v16 = vadd.f32 %v506_v3, %v354_v12  ;;  %v510_v17 = vmul.f32 %v438_v2, %v60_v14  ;;  %v1209_v2 = vld [vmem:[%s1560_s5] ss:$8 sps:$4 sm:$0xff]   ;;  %v1251_v3 = vmov 0   ;;  %v948_v12 = vrot.slane %v1411_v46, %v943_v10 }
 0x298   :  { %1134 = vmatpush3.xpose.msk.msra.mxu1 %vm355_vm3, %v514_v4 }
 0x299   :  { %1135 = vmatprep.subr.mxu1 %v1249_v28  ;;  %v519_v19 = vmul.f32 %v507_v16, %v68_v1  ;;  %v518_v20 = vmul.f32 %v507_v16, %v66_v6  ;;  %v517_v21 = vmul.f32 %v507_v16, %v64_v8  ;;  %v516_v22 = vmul.f32 %v507_v16, %v62_v11  ;;  %v1211_v1 = vld [vmem:[%s1560_s5 + $0x4] ss:$8 sps:$4 sm:$0xff]  }
 0x29a   :  { %v515_v23 = vmul.f32 %v507_v16, %v60_v14  ;;  %v944_v11 = vrot.slane %v1388_v32, %v943_v10 }
 0x29c   :  { %1136 = vmatpush3.xpose.msk.msra.mxu1 %vm355_vm3, %v513_v7 }
 0x29d   :  { %1137 = vmatprep.subr.mxu1 %v1249_v28 }
 0x2a0   :  { %1138 = vmatpush3.xpose.msk.msra.mxu1 %vm355_vm3, %v512_v9 }
 0x2a1   :  { %1139 = vmatprep.subr.mxu1 %v1249_v28 }
 0x2a4   :  { %1140 = vmatpush3.xpose.msk.msra.mxu1 %vm355_vm3, %v511_v13 }
 0x2a5   :  { %1141 = vmatprep.subr.mxu1 %v1249_v28 }
 0x2a8   :  { %1142 = vmatpush3.xpose.msk.msra.mxu1 %vm355_vm3, %v510_v17 }
 0x2a9   :  { %1159 = vmatprep.subr.mxu1 %v1249_v28 }
 0x2ab   :  { %1144 = vmatmul.mubr.msk.f32.vlgmr.msra.gmra.mxu1 %vm355_vm3, %v436_v18 }
 0x2ac   :  { %1160 = vmatpush3.msra.mxu1 %v519_v19  ;;  %1169 = vmatprep.mubr.msk.f32.mxu1 %vm1250_vm2, %v1249_v28 }
 0x2ad   :  { %1161 = vmatprep.subr.mxu1 %v1249_v28 }
 0x2ae   :  { %1162 = vmatpush3.msra.mxu1 %v518_v20 }
 0x2af   :  { %1163 = vmatprep.subr.mxu1 %v1249_v28 }
 0x2b0   :  { %1164 = vmatpush3.msra.mxu1 %v517_v21 }
 0x2b1   :  { %1165 = vmatprep.subr.mxu1 %v1249_v28 }
 0x2b2   :  { %1166 = vmatpush3.msra.mxu1 %v516_v22 }
 0x2b3   :  { %1167 = vmatprep.subr.mxu1 %v1249_v28 }
 0x2b4   :  { %1168 = vmatpush3.msra.mxu1 %v515_v23 }
 0x2b5   :  { %984 = vmatprep.subr.bf16.mxu1 %v1208_v52 }
 0x36b   :  { %v604_v24 = vpop.f32.mrf.mxu1 }
 0x36c   :  { %v609_v25 = vsel %vm608_vm4, %v604_v24, -inf }
 0x36d   :  { %v1145_v26 = vpop.f32.mrf.mxu1  ;;  %610 = vmax.xlane.f32.xlu0 %v609_v25 }
 0x3f6   :  { %v611_v35 = vpop.xlane.xlu0 %610 }
 0x3f7   :  { %v612_v36 = vsub.f32 %v604_v24, %v611_v35 }
 0x3f9   :  { %v613_v37 = vmul.f32 1.442695, %v612_v36 }
 0x3fb   :  { %1214 = vpow2.f32 %v613_v37 }
 0x408   :  { %v1215_v38 = vpop.eup %1214 }
 0x409   :  { %1157 = vmatmul.mubr.msk.f32.vlgmr.msra.gmra.mxu0 %vm608_vm4, %v1215_v38 }
 0x40a   :  { %1176 = vmatprep.mubr.msk.f32.mxu0 %vm1250_vm2, %v1249_v28  ;;  %1173 = vmatpush3.msk.msra.mxu0 %vm359_vm1, %v58_v39 }
 0x40b   :  { %1174 = vmatprep.subr.mxu0 %v1249_v28 }
 0x40c   :  { %1175 = vmatpush3.msra.mxu0 %v53_v40 }
 0x40d   :  { %1179 = vmatprep.subr.mxu0 %v1249_v28 }
 0x4c9   :  { %v684_v41 = vpop.f32.mrf.mxu0 }
 0x4ca   :  { %v688_v42 = vmax.f32 %v684_v41, 1e-30 }
 0x4cb   :  { %v1158_v43 = vpop.f32.mrf.mxu0 }
 0x4cc   :  { %1216 = vrcp.f32 %v688_v42 }
 0x4d9   :  { %v1217_v44 = vpop.eup %1216 }
 0x4da   :  { %v690_v45 = vmul.f32 %v1217_v44, %v1215_v38 }
 0x4dc   :  { %1170 = vmatmul.mubr.msk.f32.vlgmr.msra.gmra.mxu1 %vm608_vm4, %v690_v45 }
 0x4dd   :  { %985 = vmatpush1.bf16.msra.mxu1 %v1206_v51  ;;  %1004 = vmatprep.mubr.bf16.mxu1 %v1251_v3 }
 0x4de   :  { %986 = vmatprep.subr.bf16.mxu1 %v1211_v1 }
 0x4e1   :  { %987 = vmatpush1.bf16.msra.mxu1 %v1209_v2 }
 0x59c   :  { %v760_v47 = vpop.f32.mrf.mxu1 }
 0x59d   :  { %1177 = vmatmul.mubr.msk.f32.vlgmr.msra.gmra.mxu0 %vm355_vm3, %v760_v47 }
 0x59e   :  { %v1171_v48 = vpop.f32.mrf.mxu1  ;;  %1183 = vmatprep.mubr.msk.f32.mxu0 %vm1250_vm2, %v1249_v28  ;;  %1180 = vmatpush3.msk.msra.mxu0 %vm359_vm1, %v59_v49 }
 0x59f   :  { %1181 = vmatprep.subr.mxu0 %v1249_v28 }
 0x5a0   :  { %1182 = vmatpush3.msra.mxu0 %v54_v50 }
 0x65d   :  { %v840_v28 = vpop.f32.mrf.mxu0 }
 0x65e   :  { %v841_v57 = vadd.f32 %v840_v28, %v767_v54 }
 0x65f   :  { %v1178_v60 = vpop.f32.mrf.mxu0 }
 0x660   :  { %v844_v61 = vadd.f32 %v841_v57, %v1424_v58  ;;  %v857_v58 = vsub.s32 6, %v1385_v30 }
 0x662   :  { %v849_v63 = vmul.f32 %v848_v59, %v844_v61  ;;  %v858_v4 = vrot.slane %v1388_v32, %v857_v58 }
 0x664   :  { %v854_v0 = vadd.f32 %v853_v62, %v849_v63 }
 0x666   :  { %1184 = vmatmul.mubr.msk.f32.vlgmr.msra.gmra.mxu0 %vm355_vm3, %v854_v0 }
 0x726   :  { %v931_v5 = vpop.f32.mrf.mxu0 }
 0x727   :  { %v932_v6 = vadd.f32 %v931_v5, %v858_v4 }
 0x728   :  { %v1185_v7 = vpop.f32.mrf.mxu0 }
 0x729   :  { %v935_v8 = vmax.f32 %v932_v6, 0.0 }
 0x72b   :  { %v936_v9 = vpack.c.bf16 %v935_v8, %v935_v8 }
 0x72d   :  { %1074 = vmatmul.mubr.msk.bf16.vlgmr.msra.gmra.mxu1 %vm261_vm0, %v936_v9 }
 0x7ed   :  { %v1006_v13 = vpop.f32.mrf.mxu1 }
 0x7ee   :  { %v1007_v14 = vadd.f32 %v1006_v13, %v944_v11 }
 0x7ef   :  { %v1008_v15 = vpop.f32.mrf.mxu1 }
 0x7f0   :  { %v1075_v16 = vmul.f32 -1.442695, %v1007_v14  ;;  %v1009_v17 = vadd.f32 %v1008_v15, %v948_v12 }
 0x7f1   :  { %v1010_v18 = vpop.f32.mrf.mxu1 }
 0x7f2   :  { %1218 = vpow2.f32 %v1075_v16  ;;  %v1076_v19 = vmul.f32 -1.442695, %v1009_v17 }
 0x7f3   :  { %v1011_v20 = vpop.f32.mrf.mxu1 }
 0x7f4   :  { %1220 = vpow2.f32 %v1076_v19 }
 0x7ff   :  { %v1219_v21 = vpop.eup %1218 }
 0x800   :  { %v1019_v22 = vadd.f32 1.0, %v1219_v21 }
 0x801   :  { %v1221_v23 = vpop.eup %1220 }
 0x802   :  { %1222 = vrcp.f32 %v1019_v22  ;;  %v1020_v24 = vadd.f32 1.0, %v1221_v23 }
 0x804   :  { %1224 = vrcp.f32 %v1020_v24 }
 0x80f   :  { %v1223_v30 = vpop.eup %1222 }
 0x810   :  { %1025 = vst [vmem:[%s1563_s8] sm:$0xff] %v1223_v30 }
 0x811   :  { %v1225_v32 = vpop.eup %1224 }
 0x812   :  { %1026 = vst [vmem:[%s1563_s8 + $0x8] sm:$0xff] %v1225_v32 }
 0x813   :  { %1035 = vsyncpa [#allocation3], 1 }

</bundles_post_ra>
